<compile_context>
chip_gen: v5e
topology: v5e:2x2
jax: 0.10.0
libtpu: 0.0.40
codegen_flags: <defaults>
</compile_context>

<pallas_src>
import jax
import jax.numpy as jnp
from jax import lax
from jax.experimental import pallas as pl
from jax.experimental.pallas import tpu as pltpu


# ----------------------------------------------------------------------------
# Pallas kernel
# ----------------------------------------------------------------------------
def _make_actor_kernel(n_layers: int, action_dim: int, max_action: float,
                       has_noise: bool, eps: float = 1e-5):
    def kernel(*refs):
        # refs layout: [x, (wc_i, vec_i, mask_i) * n_layers, wh, bh, (noise?), out]
        idx = 0
        h = refs[idx][...].astype(jnp.float32)          # (TB, state_dim)
        idx += 1

        for _ in range(n_layers):
            w = refs[idx][...]                          # (in, out) bf16 == (W + RW)^T
            vec = refs[idx + 1][...]                    # (3, out) f32: [b+rb, gamma, beta]
            mask = refs[idx + 2][...]                   # (TB, out) bf16
            idx += 3
            b, gamma, beta = vec[0:1, :], vec[1:2, :], vec[2:3, :]

            # fused matmul (bf16 MXU, f32 accumulate) + fused bias
            h = jnp.dot(h.astype(jnp.bfloat16), w,
                        preferred_element_type=jnp.float32) + b

            # one-pass LayerNorm over the feature axis (biased var, eps=1e-5)
            mu = jnp.mean(h, axis=-1, keepdims=True)
            ms = jnp.mean(h * h, axis=-1, keepdims=True)
            var = jnp.maximum(ms - mu * mu, 0.0)
            h = (h - mu) * (lax.rsqrt(var + eps) * gamma) + beta

            # ReLU then mask gating (mask is exact {0,1} in bf16)
            h = jnp.maximum(h, 0.0) * mask.astype(jnp.float32)

        wh = refs[idx][...]                             # (H_last, P) bf16: cols [mean | log_std | 0]
        bh = refs[idx + 1][...]                         # (1, P) f32
        idx += 2
        if has_noise:
            h = h + refs[idx][...].astype(jnp.float32)  # (TB, H_last) bf16
            idx += 1
        out_ref = refs[idx]

        # fused heads: single lane-dense matmul, per-column transform.
        y = jnp.dot(h.astype(jnp.bfloat16), wh,
                    preferred_element_type=jnp.float32) + bh
        col = lax.broadcasted_iota(jnp.int32, y.shape, 1)
        # tanh skipped when max_action == 1.0, exactly like the PyTorch module.
        mean_branch = (max_action * jnp.tanh(y)) if max_action != 1.0 else y
        logstd_branch = jnp.clip(y, -20.0, 2.0)
        out_ref[...] = jnp.where(col < action_dim, mean_branch,
                                 logstd_branch).astype(out_ref.dtype)

    return kernel


# ----------------------------------------------------------------------------
# One-time parameter preparation (hoisted out of the per-call path)
# ----------------------------------------------------------------------------
def _round_up(x, m):
    return ((x + m - 1) // m) * m


def prepare_actor_params(params):
    """Fuse layer/residual weights, pack LN vectors, pad the two heads. Run once."""
    n_layers = len(params["layers"])
    fused_w, fused_vec, hidden_dims = [], [], []
    for i in range(n_layers):
        w, b = params["layers"][i]                 # (in, out), (out,)
        rw, rb = params["residual_layers"][i]
        g, be = params["layer_norms"][i]
        fused_w.append((w.astype(jnp.float32) + rw.astype(jnp.float32))
                       .astype(jnp.bfloat16))
        fused_vec.append(jnp.stack([b + rb, g, be], axis=0).astype(jnp.float32))
        hidden_dims.append(w.shape[1])

    wm, bm = params["mean"]
    ws, bs = params["log_std"]
    H, A = wm.shape
    P = _round_up(max(2 * A, 128), 128)            # lane-dense padded head width
    wh = jnp.zeros((H, P), jnp.float32)
    wh = wh.at[:, :A].set(wm).at[:, A:2 * A].set(ws)
    bh = jnp.zeros((1, P), jnp.float32)
    bh = bh.at[0, :A].set(bm).at[0, A:2 * A].set(bs)

    return {"w": fused_w, "vec": fused_vec,
            "wh": wh.astype(jnp.bfloat16), "bh": bh,
            "state_dim": params["layers"][0][0].shape[0],
            "hidden_dims": hidden_dims, "action_dim": A, "head_pad": P}


# ----------------------------------------------------------------------------
# Forward wrapper
# ----------------------------------------------------------------------------
_ROW = 16          # row granularity (bf16 sublane-pack friendly)
_MAX_TILE = 1024   # per-tile working set stays far below scoped VMEM


def actor_forward(state, masks, fused, max_action, noise=None):
    """state: (B, state_dim); masks: list of (B, H_i). Returns (mean, log_std)."""
    B, state_dim = state.shape
    hidden_dims = fused["hidden_dims"]
    n_layers = len(hidden_dims)
    h_last = hidden_dims[-1]
    A = fused["action_dim"]
    P = fused["head_pad"]

    # Batch tiling: big tiles to amortize per-step overhead, but at least two
    # tiles whenever the batch allows it so the "parallel" grid axis shards
    # across both TensorCores on v7x.
    B_r = _round_up(B, _ROW)
    if B_r <= _ROW:
        TB = B_r
    else:
        TB = min(_MAX_TILE, _round_up(pl.cdiv(B_r, 2), _ROW))
    B_pad = _round_up(B_r, TB)
    nb = B_pad // TB

    def pad_rows(a):
        return a if a.shape[0] == B_pad else jnp.pad(a, ((0, B_pad - a.shape[0]), (0, 0)))

    def as_bf16(a):
        return a if a.dtype == jnp.bfloat16 else a.astype(jnp.bfloat16)

    inputs = [pad_rows(state.astype(jnp.float32))]
    in_specs = [pl.BlockSpec((TB, state_dim), lambda i: (i, 0))]

    for li in range(n_layers):
        w, vec = fused["w"][li], fused["vec"][li]
        m = pad_rows(as_bf16(masks[li]))           # binary mask -> bf16 is exact
        inputs += [w, vec, m]
        in_specs += [
            pl.BlockSpec(w.shape, lambda i: (0, 0)),        # resident weights
            pl.BlockSpec(vec.shape, lambda i: (0, 0)),      # resident LN/bias pack
            pl.BlockSpec((TB, hidden_dims[li]), lambda i: (i, 0)),
        ]

    inputs += [fused["wh"], fused["bh"]]
    in_specs += [pl.BlockSpec(fused["wh"].shape, lambda i: (0, 0)),
                 pl.BlockSpec(fused["bh"].shape, lambda i: (0, 0))]

    has_noise = noise is not None
    if has_noise:
        inputs.append(pad_rows(as_bf16(noise.reshape(B, h_last))))
        in_specs.append(pl.BlockSpec((TB, h_last), lambda i: (i, 0)))

    kernel = _make_actor_kernel(n_layers, A, float(max_action), has_noise)
    out = pl.pallas_call(
        kernel,
        out_shape=jax.ShapeDtypeStruct((B_pad, P), jnp.bfloat16),
        grid=(nb,),
        in_specs=in_specs,
        out_specs=pl.BlockSpec((TB, P), lambda i: (i, 0)),
        compiler_params=pltpu.CompilerParams(
            dimension_semantics=("parallel",)),
    )(*inputs)

    mean = out[:B, :A].astype(jnp.float32)
    log_std = out[:B, A:2 * A].astype(jnp.float32)
    return mean, log_std


# ----------------------------------------------------------------------------
# Deterministic parameter init (orthogonal weights like the PyTorch module;
# biases get a small perturbation so the bias path is actually exercised).
# ----------------------------------------------------------------------------
def _orthogonal(key, n_in, n_out):
    big, small = max(n_in, n_out), min(n_in, n_out)
    a = jax.random.normal(key, (big, small), dtype=jnp.float32)
    q, r = jnp.linalg.qr(a)
    q = q * jnp.sign(jnp.diagonal(r))[None, :]
    if n_in >= n_out:
        return q[:n_in, :n_out]
    return q.T[:n_in, :n_out]


def init_actor_params(key, state_dim, action_dim, hidden_dims):
    dims = [state_dim] + list(hidden_dims)
    n_h = len(hidden_dims)
    keys = jax.random.split(key, 4 * n_h + 4)
    layers, residual_layers, layer_norms = [], [], []
    k = 0
    for i in range(n_h):
        n_in, n_out = dims[i], dims[i + 1]
        layers.append((_orthogonal(keys[k], n_in, n_out),
                       0.05 * jax.random.normal(keys[k + 1], (n_out,), jnp.float32)))
        residual_layers.append((_orthogonal(keys[k + 2], n_in, n_out),
                                0.05 * jax.random.normal(keys[k + 3], (n_out,), jnp.float32)))
        layer_norms.append((jnp.ones((n_out,), jnp.float32),
                            jnp.zeros((n_out,), jnp.float32)))
        k += 4
    mean = (_orthogonal(keys[k], hidden_dims[-1], action_dim),
            0.05 * jax.random.normal(keys[k + 1], (action_dim,), jnp.float32))
    log_std = (_orthogonal(keys[k + 2], hidden_dims[-1], action_dim),
               0.05 * jax.random.normal(keys[k + 3], (action_dim,), jnp.float32))
    return {"layers": layers, "residual_layers": residual_layers,
            "layer_norms": layer_norms, "mean": mean, "log_std": log_std}


# ----------------------------------------------------------------------------
# Pure-JAX reference with the same precision policy (bf16 dot inputs, f32 LN)
# ----------------------------------------------------------------------------
def actor_ref(state, masks, params, max_action, noise=None, eps=1e-5):
    h = state.astype(jnp.float32)
    for i in range(len(params["layers"])):
        w, b = params["layers"][i]
        rw, rb = params["residual_layers"][i]
        g, be = params["layer_norms"][i]
        wc = (w + rw).astype(jnp.bfloat16)
        h = jnp.dot(h.astype(jnp.bfloat16), wc,
                    preferred_element_type=jnp.float32) + (b + rb)
        mu = h.mean(-1, keepdims=True)
        var = jnp.square(h - mu).mean(-1, keepdims=True)
        h = (h - mu) * (lax.rsqrt(var + eps) * g) + be
        h = jnp.maximum(h, 0.0) * masks[i].astype(jnp.float32)
    if noise is not None:
        h = h + noise.reshape(h.shape)
    wm, bm = params["mean"]
    ws, bs = params["log_std"]
    mean = jnp.dot(h.astype(jnp.bfloat16), wm.astype(jnp.bfloat16),
                   preferred_element_type=jnp.float32) + bm
    if max_action != 1.0:
        mean = max_action * jnp.tanh(mean)
    log_std = jnp.dot(h.astype(jnp.bfloat16), ws.astype(jnp.bfloat16),
                      preferred_element_type=jnp.float32) + bs
    log_std = jnp.clip(log_std, -20.0, 2.0)
    return mean, log_std


if __name__ == "__main__":
    B, state_dim, action_dim = 8, 12, 4
    hidden_dims = [64, 32, 16]
    max_action = 2.0

    key = jax.random.PRNGKey(0)
    k_state, k_params, k_mask, k_noise = jax.random.split(key, 4)

    state = jax.random.normal(k_state, (B, state_dim), dtype=jnp.float32)
    mask_keys = jax.random.split(k_mask, len(hidden_dims))
    # masks are binary -> generated directly in bf16 (exact), no per-call cast
    masks = [jax.random.bernoulli(mask_keys[i], 0.8, (B, hidden_dims[i])
                                  ).astype(jnp.bfloat16)
             for i in range(len(hidden_dims))]
    params = init_actor_params(k_params, state_dim, action_dim, hidden_dims)
    fused = prepare_actor_params(params)          # one-time prep, reused per call

    # noise=None path (the PyTorch default)
    mean, log_std = actor_forward(state, masks, fused, max_action)
    mean = jax.block_until_ready(mean)
    log_std = jax.block_until_ready(log_std)
    ref_mean, ref_log_std = actor_ref(state, masks, params, max_action)
    assert mean.shape == (B, action_dim) and log_std.shape == (B, action_dim)
    assert jnp.allclose(mean, ref_mean, atol=1e-2, rtol=1e-2)
    assert jnp.allclose(log_std, ref_log_std, atol=1e-2, rtol=1e-2)

    # noise path
    noise = 0.1 * jax.random.normal(k_noise, (B, hidden_dims[-1]), jnp.float32)
    mean_n, log_std_n = actor_forward(state, masks, fused, max_action, noise=noise)
    mean_n = jax.block_until_ready(mean_n)
    rm, rl = actor_ref(state, masks, params, max_action, noise=noise)
    assert jnp.allclose(mean_n, rm, atol=1e-2, rtol=1e-2)
    assert jnp.allclose(log_std_n, rl, atol=1e-2, rtol=1e-2)

    print("KERNEL_OK")
</pallas_src>

<mosaic_0001>
module attributes {stable_mosaic.version = 11 : i64} {
  func.func @kernel(%arg0: i32, %arg1: memref<16x12xf32, #tpu.memory_space<vmem>>, %arg2: memref<12x64xbf16, #tpu.memory_space<vmem>>, %arg3: memref<3x64xf32, #tpu.memory_space<vmem>>, %arg4: memref<16x64xbf16, #tpu.memory_space<vmem>>, %arg5: memref<64x32xbf16, #tpu.memory_space<vmem>>, %arg6: memref<3x32xf32, #tpu.memory_space<vmem>>, %arg7: memref<16x32xbf16, #tpu.memory_space<vmem>>, %arg8: memref<32x16xbf16, #tpu.memory_space<vmem>>, %arg9: memref<3x16xf32, #tpu.memory_space<vmem>>, %arg10: memref<16x16xbf16, #tpu.memory_space<vmem>>, %arg11: memref<16x128xbf16, #tpu.memory_space<vmem>>, %arg12: memref<1x128xf32, #tpu.memory_space<vmem>>, %arg13: memref<16x128xbf16, #tpu.memory_space<vmem>>) attributes {dimension_semantics = [#tpu.dimension_semantics<parallel>], iteration_bounds = array<i64: 1>, scalar_prefetch = 0 : i64, scratch_operands = 0 : i64, tpu.core_type = #tpu.core_type<tc>, window_params = [{transform_indices = @transform_0, window_bounds = array<i64: 16, 12>}, {pipeline_mode = #tpu.pipeline_mode<synchronous>, transform_indices = @transform_1, window_bounds = array<i64: 12, 64>}, {pipeline_mode = #tpu.pipeline_mode<synchronous>, transform_indices = @transform_2, window_bounds = array<i64: 3, 64>}, {transform_indices = @transform_3, window_bounds = array<i64: 16, 64>}, {pipeline_mode = #tpu.pipeline_mode<synchronous>, transform_indices = @transform_4, window_bounds = array<i64: 64, 32>}, {pipeline_mode = #tpu.pipeline_mode<synchronous>, transform_indices = @transform_5, window_bounds = array<i64: 3, 32>}, {transform_indices = @transform_6, window_bounds = array<i64: 16, 32>}, {pipeline_mode = #tpu.pipeline_mode<synchronous>, transform_indices = @transform_7, window_bounds = array<i64: 32, 16>}, {pipeline_mode = #tpu.pipeline_mode<synchronous>, transform_indices = @transform_8, window_bounds = array<i64: 3, 16>}, {transform_indices = @transform_9, window_bounds = array<i64: 16, 16>}, {pipeline_mode = #tpu.pipeline_mode<synchronous>, transform_indices = @transform_10, window_bounds = array<i64: 16, 128>}, {pipeline_mode = #tpu.pipeline_mode<synchronous>, transform_indices = @transform_11, window_bounds = array<i64: 1, 128>}, {transform_indices = @transform_12, window_bounds = array<i64: 16, 128>}]} {
    %c0 = arith.constant 0 : index
    %c0_0 = arith.constant 0 : index
    %0 = vector.load %arg1[%c0, %c0_0] : memref<16x12xf32, #tpu.memory_space<vmem>>, vector<16x12xf32>
    %c0_1 = arith.constant 0 : index
    %c0_2 = arith.constant 0 : index
    %1 = vector.load %arg2[%c0_1, %c0_2] : memref<12x64xbf16, #tpu.memory_space<vmem>>, vector<12x64xbf16>
    %c0_3 = arith.constant 0 : index
    %c0_4 = arith.constant 0 : index
    %2 = vector.load %arg3[%c0_3, %c0_4] : memref<3x64xf32, #tpu.memory_space<vmem>>, vector<3x64xf32>
    %c0_5 = arith.constant 0 : index
    %c0_6 = arith.constant 0 : index
    %3 = vector.load %arg4[%c0_5, %c0_6] : memref<16x64xbf16, #tpu.memory_space<vmem>>, vector<16x64xbf16>
    %4 = vector.extract_strided_slice %2 {offsets = [0, 0], sizes = [1, 64], strides = [1, 1]} : vector<3x64xf32> to vector<1x64xf32>
    %5 = vector.extract_strided_slice %2 {offsets = [1, 0], sizes = [1, 64], strides = [1, 1]} : vector<3x64xf32> to vector<1x64xf32>
    %6 = vector.extract_strided_slice %2 {offsets = [2, 0], sizes = [1, 64], strides = [1, 1]} : vector<3x64xf32> to vector<1x64xf32>
    %7 = arith.truncf %0 : vector<16x12xf32> to vector<16x12xbf16>
    %cst = arith.constant dense<0.000000e+00> : vector<16x64xf32>
    %8 = tpu.matmul %7, %1, %cst {dimension_numbers = #tpu.dot_dimension_numbers<[1], [0], [0], [1], [0, 0, 1, 1], [], []>} : vector<16x12xbf16>, vector<12x64xbf16>, vector<16x64xf32> -> vector<16x64xf32>
    %9 = vector.broadcast %4 : vector<1x64xf32> to vector<16x64xf32>
    %10 = arith.addf %8, %9 : vector<16x64xf32>
    %cst_7 = arith.constant dense<0.000000e+00> : vector<16xf32>
    %11 = vector.multi_reduction <add>, %10, %cst_7 [1] : vector<16x64xf32> to vector<16xf32>
    %12 = vector.shape_cast %11 : vector<16xf32> to vector<16x1xf32>
    %cst_8 = arith.constant 6.400000e+01 : f32
    %13 = vector.broadcast %cst_8 : f32 to vector<16x1xf32>
    %14 = arith.divf %12, %13 : vector<16x1xf32>
    %15 = arith.mulf %10, %10 : vector<16x64xf32>
    %cst_9 = arith.constant dense<0.000000e+00> : vector<16xf32>
    %16 = vector.multi_reduction <add>, %15, %cst_9 [1] : vector<16x64xf32> to vector<16xf32>
    %17 = vector.shape_cast %16 : vector<16xf32> to vector<16x1xf32>
    %cst_10 = arith.constant 6.400000e+01 : f32
    %18 = vector.broadcast %cst_10 : f32 to vector<16x1xf32>
    %19 = arith.divf %17, %18 : vector<16x1xf32>
    %20 = arith.mulf %14, %14 : vector<16x1xf32>
    %21 = arith.subf %19, %20 : vector<16x1xf32>
    %cst_11 = arith.constant 0.000000e+00 : f32
    %22 = vector.broadcast %cst_11 : f32 to vector<16x1xf32>
    %23 = arith.maximumf %21, %22 : vector<16x1xf32>
    %24 = vector.broadcast %14 : vector<16x1xf32> to vector<16x64xf32>
    %25 = arith.subf %10, %24 : vector<16x64xf32>
    %cst_12 = arith.constant 9.99999974E-6 : f32
    %26 = vector.broadcast %cst_12 : f32 to vector<16x1xf32>
    %27 = arith.addf %23, %26 : vector<16x1xf32>
    %28 = math.rsqrt %27 : vector<16x1xf32>
    %29 = vector.broadcast %28 : vector<16x1xf32> to vector<16x64xf32>
    %30 = vector.broadcast %5 : vector<1x64xf32> to vector<16x64xf32>
    %31 = arith.mulf %29, %30 : vector<16x64xf32>
    %32 = arith.mulf %25, %31 : vector<16x64xf32>
    %33 = vector.broadcast %6 : vector<1x64xf32> to vector<16x64xf32>
    %34 = arith.addf %32, %33 : vector<16x64xf32>
    %cst_13 = arith.constant 0.000000e+00 : f32
    %35 = vector.broadcast %cst_13 : f32 to vector<16x64xf32>
    %36 = arith.maximumf %34, %35 : vector<16x64xf32>
    %37 = arith.extf %3 : vector<16x64xbf16> to vector<16x64xf32>
    %38 = arith.mulf %36, %37 : vector<16x64xf32>
    %c0_14 = arith.constant 0 : index
    %c0_15 = arith.constant 0 : index
    %39 = vector.load %arg5[%c0_14, %c0_15] : memref<64x32xbf16, #tpu.memory_space<vmem>>, vector<64x32xbf16>
    %c0_16 = arith.constant 0 : index
    %c0_17 = arith.constant 0 : index
    %40 = vector.load %arg6[%c0_16, %c0_17] : memref<3x32xf32, #tpu.memory_space<vmem>>, vector<3x32xf32>
    %c0_18 = arith.constant 0 : index
    %c0_19 = arith.constant 0 : index
    %41 = vector.load %arg7[%c0_18, %c0_19] : memref<16x32xbf16, #tpu.memory_space<vmem>>, vector<16x32xbf16>
    %42 = vector.extract_strided_slice %40 {offsets = [0, 0], sizes = [1, 32], strides = [1, 1]} : vector<3x32xf32> to vector<1x32xf32>
    %43 = vector.extract_strided_slice %40 {offsets = [1, 0], sizes = [1, 32], strides = [1, 1]} : vector<3x32xf32> to vector<1x32xf32>
    %44 = vector.extract_strided_slice %40 {offsets = [2, 0], sizes = [1, 32], strides = [1, 1]} : vector<3x32xf32> to vector<1x32xf32>
    %45 = arith.truncf %38 : vector<16x64xf32> to vector<16x64xbf16>
    %cst_20 = arith.constant dense<0.000000e+00> : vector<16x32xf32>
    %46 = tpu.matmul %45, %39, %cst_20 {dimension_numbers = #tpu.dot_dimension_numbers<[1], [0], [0], [1], [0, 0, 1, 1], [], []>} : vector<16x64xbf16>, vector<64x32xbf16>, vector<16x32xf32> -> vector<16x32xf32>
    %47 = vector.broadcast %42 : vector<1x32xf32> to vector<16x32xf32>
    %48 = arith.addf %46, %47 : vector<16x32xf32>
    %cst_21 = arith.constant dense<0.000000e+00> : vector<16xf32>
    %49 = vector.multi_reduction <add>, %48, %cst_21 [1] : vector<16x32xf32> to vector<16xf32>
    %50 = vector.shape_cast %49 : vector<16xf32> to vector<16x1xf32>
    %cst_22 = arith.constant 3.200000e+01 : f32
    %51 = vector.broadcast %cst_22 : f32 to vector<16x1xf32>
    %52 = arith.divf %50, %51 : vector<16x1xf32>
    %53 = arith.mulf %48, %48 : vector<16x32xf32>
    %cst_23 = arith.constant dense<0.000000e+00> : vector<16xf32>
    %54 = vector.multi_reduction <add>, %53, %cst_23 [1] : vector<16x32xf32> to vector<16xf32>
    %55 = vector.shape_cast %54 : vector<16xf32> to vector<16x1xf32>
    %cst_24 = arith.constant 3.200000e+01 : f32
    %56 = vector.broadcast %cst_24 : f32 to vector<16x1xf32>
    %57 = arith.divf %55, %56 : vector<16x1xf32>
    %58 = arith.mulf %52, %52 : vector<16x1xf32>
    %59 = arith.subf %57, %58 : vector<16x1xf32>
    %cst_25 = arith.constant 0.000000e+00 : f32
    %60 = vector.broadcast %cst_25 : f32 to vector<16x1xf32>
    %61 = arith.maximumf %59, %60 : vector<16x1xf32>
    %62 = vector.broadcast %52 : vector<16x1xf32> to vector<16x32xf32>
    %63 = arith.subf %48, %62 : vector<16x32xf32>
    %cst_26 = arith.constant 9.99999974E-6 : f32
    %64 = vector.broadcast %cst_26 : f32 to vector<16x1xf32>
    %65 = arith.addf %61, %64 : vector<16x1xf32>
    %66 = math.rsqrt %65 : vector<16x1xf32>
    %67 = vector.broadcast %66 : vector<16x1xf32> to vector<16x32xf32>
    %68 = vector.broadcast %43 : vector<1x32xf32> to vector<16x32xf32>
    %69 = arith.mulf %67, %68 : vector<16x32xf32>
    %70 = arith.mulf %63, %69 : vector<16x32xf32>
    %71 = vector.broadcast %44 : vector<1x32xf32> to vector<16x32xf32>
    %72 = arith.addf %70, %71 : vector<16x32xf32>
    %cst_27 = arith.constant 0.000000e+00 : f32
    %73 = vector.broadcast %cst_27 : f32 to vector<16x32xf32>
    %74 = arith.maximumf %72, %73 : vector<16x32xf32>
    %75 = arith.extf %41 : vector<16x32xbf16> to vector<16x32xf32>
    %76 = arith.mulf %74, %75 : vector<16x32xf32>
    %c0_28 = arith.constant 0 : index
    %c0_29 = arith.constant 0 : index
    %77 = vector.load %arg8[%c0_28, %c0_29] : memref<32x16xbf16, #tpu.memory_space<vmem>>, vector<32x16xbf16>
    %c0_30 = arith.constant 0 : index
    %c0_31 = arith.constant 0 : index
    %78 = vector.load %arg9[%c0_30, %c0_31] : memref<3x16xf32, #tpu.memory_space<vmem>>, vector<3x16xf32>
    %c0_32 = arith.constant 0 : index
    %c0_33 = arith.constant 0 : index
    %79 = vector.load %arg10[%c0_32, %c0_33] : memref<16x16xbf16, #tpu.memory_space<vmem>>, vector<16x16xbf16>
    %80 = vector.extract_strided_slice %78 {offsets = [0, 0], sizes = [1, 16], strides = [1, 1]} : vector<3x16xf32> to vector<1x16xf32>
    %81 = vector.extract_strided_slice %78 {offsets = [1, 0], sizes = [1, 16], strides = [1, 1]} : vector<3x16xf32> to vector<1x16xf32>
    %82 = vector.extract_strided_slice %78 {offsets = [2, 0], sizes = [1, 16], strides = [1, 1]} : vector<3x16xf32> to vector<1x16xf32>
    %83 = arith.truncf %76 : vector<16x32xf32> to vector<16x32xbf16>
    %cst_34 = arith.constant dense<0.000000e+00> : vector<16x16xf32>
    %84 = tpu.matmul %83, %77, %cst_34 {dimension_numbers = #tpu.dot_dimension_numbers<[1], [0], [0], [1], [0, 0, 1, 1], [], []>} : vector<16x32xbf16>, vector<32x16xbf16>, vector<16x16xf32> -> vector<16x16xf32>
    %85 = vector.broadcast %80 : vector<1x16xf32> to vector<16x16xf32>
    %86 = arith.addf %84, %85 : vector<16x16xf32>
    %cst_35 = arith.constant dense<0.000000e+00> : vector<16xf32>
    %87 = vector.multi_reduction <add>, %86, %cst_35 [1] : vector<16x16xf32> to vector<16xf32>
    %88 = vector.shape_cast %87 : vector<16xf32> to vector<16x1xf32>
    %cst_36 = arith.constant 1.600000e+01 : f32
    %89 = vector.broadcast %cst_36 : f32 to vector<16x1xf32>
    %90 = arith.divf %88, %89 : vector<16x1xf32>
    %91 = arith.mulf %86, %86 : vector<16x16xf32>
    %cst_37 = arith.constant dense<0.000000e+00> : vector<16xf32>
    %92 = vector.multi_reduction <add>, %91, %cst_37 [1] : vector<16x16xf32> to vector<16xf32>
    %93 = vector.shape_cast %92 : vector<16xf32> to vector<16x1xf32>
    %cst_38 = arith.constant 1.600000e+01 : f32
    %94 = vector.broadcast %cst_38 : f32 to vector<16x1xf32>
    %95 = arith.divf %93, %94 : vector<16x1xf32>
    %96 = arith.mulf %90, %90 : vector<16x1xf32>
    %97 = arith.subf %95, %96 : vector<16x1xf32>
    %cst_39 = arith.constant 0.000000e+00 : f32
    %98 = vector.broadcast %cst_39 : f32 to vector<16x1xf32>
    %99 = arith.maximumf %97, %98 : vector<16x1xf32>
    %100 = vector.broadcast %90 : vector<16x1xf32> to vector<16x16xf32>
    %101 = arith.subf %86, %100 : vector<16x16xf32>
    %cst_40 = arith.constant 9.99999974E-6 : f32
    %102 = vector.broadcast %cst_40 : f32 to vector<16x1xf32>
    %103 = arith.addf %99, %102 : vector<16x1xf32>
    %104 = math.rsqrt %103 : vector<16x1xf32>
    %105 = vector.broadcast %104 : vector<16x1xf32> to vector<16x16xf32>
    %106 = vector.broadcast %81 : vector<1x16xf32> to vector<16x16xf32>
    %107 = arith.mulf %105, %106 : vector<16x16xf32>
    %108 = arith.mulf %101, %107 : vector<16x16xf32>
    %109 = vector.broadcast %82 : vector<1x16xf32> to vector<16x16xf32>
    %110 = arith.addf %108, %109 : vector<16x16xf32>
    %cst_41 = arith.constant 0.000000e+00 : f32
    %111 = vector.broadcast %cst_41 : f32 to vector<16x16xf32>
    %112 = arith.maximumf %110, %111 : vector<16x16xf32>
    %113 = arith.extf %79 : vector<16x16xbf16> to vector<16x16xf32>
    %114 = arith.mulf %112, %113 : vector<16x16xf32>
    %c0_42 = arith.constant 0 : index
    %c0_43 = arith.constant 0 : index
    %115 = vector.load %arg11[%c0_42, %c0_43] : memref<16x128xbf16, #tpu.memory_space<vmem>>, vector<16x128xbf16>
    %c0_44 = arith.constant 0 : index
    %c0_45 = arith.constant 0 : index
    %116 = vector.load %arg12[%c0_44, %c0_45] : memref<1x128xf32, #tpu.memory_space<vmem>>, vector<1x128xf32>
    %117 = arith.truncf %114 : vector<16x16xf32> to vector<16x16xbf16>
    %cst_46 = arith.constant dense<0.000000e+00> : vector<16x128xf32>
    %118 = tpu.matmul %117, %115, %cst_46 {dimension_numbers = #tpu.dot_dimension_numbers<[1], [0], [0], [1], [0, 0, 1, 1], [], []>} : vector<16x16xbf16>, vector<16x128xbf16>, vector<16x128xf32> -> vector<16x128xf32>
    %119 = vector.broadcast %116 : vector<1x128xf32> to vector<16x128xf32>
    %120 = arith.addf %118, %119 : vector<16x128xf32>
    %121 = tpu.iota {dimensions = array<i32: 1>} : vector<16x128xi32>
    %122 = math.tanh %120 : vector<16x128xf32>
    %cst_47 = arith.constant 2.000000e+00 : f32
    %123 = vector.broadcast %cst_47 : f32 to vector<16x128xf32>
    %124 = arith.mulf %123, %122 : vector<16x128xf32>
    %cst_48 = arith.constant -2.000000e+01 : f32
    %cst_49 = arith.constant 2.000000e+00 : f32
    %125 = vector.broadcast %cst_48 : f32 to vector<16x128xf32>
    %126 = arith.maximumf %125, %120 : vector<16x128xf32>
    %127 = vector.broadcast %cst_49 : f32 to vector<16x128xf32>
    %128 = arith.minimumf %127, %126 : vector<16x128xf32>
    %c4_i32 = arith.constant 4 : i32
    %129 = vector.broadcast %c4_i32 : i32 to vector<16x128xi32>
    %130 = arith.cmpi slt, %121, %129 : vector<16x128xi32>
    %131 = arith.select %130, %124, %128 : vector<16x128xi1>, vector<16x128xf32>
    %132 = arith.truncf %131 : vector<16x128xf32> to vector<16x128xbf16>
    %c0_50 = arith.constant 0 : index
    %c0_51 = arith.constant 0 : index
    %133 = vector.load %arg13[%c0_50, %c0_51] : memref<16x128xbf16, #tpu.memory_space<vmem>>, vector<16x128xbf16>
    tpu.vector_store %arg13[%c0_50, %c0_51], %132 {strides = array<i32>} : memref<16x128xbf16, #tpu.memory_space<vmem>>, vector<16x128xbf16>,
    return
  }
  func.func @transform_0(%arg0: i32) -> (i32, i32) {
    %c0_i32 = arith.constant 0 : i32
    %c0_i32_0 = arith.constant 0 : i32
    return %arg0, %c0_i32 : i32, i32
  }
  func.func @transform_1(%arg0: i32) -> (i32, i32) {
    %c0_i32 = arith.constant 0 : i32
    %c0_i32_0 = arith.constant 0 : i32
    %c0_i32_1 = arith.constant 0 : i32
    return %c0_i32, %c0_i32_0 : i32, i32
  }
  func.func @transform_2(%arg0: i32) -> (i32, i32) {
    %c0_i32 = arith.constant 0 : i32
    %c0_i32_0 = arith.constant 0 : i32
    %c0_i32_1 = arith.constant 0 : i32
    return %c0_i32, %c0_i32_0 : i32, i32
  }
  func.func @transform_3(%arg0: i32) -> (i32, i32) {
    %c0_i32 = arith.constant 0 : i32
    %c0_i32_0 = arith.constant 0 : i32
    return %arg0, %c0_i32 : i32, i32
  }
  func.func @transform_4(%arg0: i32) -> (i32, i32) {
    %c0_i32 = arith.constant 0 : i32
    %c0_i32_0 = arith.constant 0 : i32
    %c0_i32_1 = arith.constant 0 : i32
    return %c0_i32, %c0_i32_0 : i32, i32
  }
  func.func @transform_5(%arg0: i32) -> (i32, i32) {
    %c0_i32 = arith.constant 0 : i32
    %c0_i32_0 = arith.constant 0 : i32
    %c0_i32_1 = arith.constant 0 : i32
    return %c0_i32, %c0_i32_0 : i32, i32
  }
  func.func @transform_6(%arg0: i32) -> (i32, i32) {
    %c0_i32 = arith.constant 0 : i32
    %c0_i32_0 = arith.constant 0 : i32
    return %arg0, %c0_i32 : i32, i32
  }
  func.func @transform_7(%arg0: i32) -> (i32, i32) {
    %c0_i32 = arith.constant 0 : i32
    %c0_i32_0 = arith.constant 0 : i32
    %c0_i32_1 = arith.constant 0 : i32
    return %c0_i32, %c0_i32_0 : i32, i32
  }
  func.func @transform_8(%arg0: i32) -> (i32, i32) {
    %c0_i32 = arith.constant 0 : i32
    %c0_i32_0 = arith.constant 0 : i32
    %c0_i32_1 = arith.constant 0 : i32
    return %c0_i32, %c0_i32_0 : i32, i32
  }
  func.func @transform_9(%arg0: i32) -> (i32, i32) {
    %c0_i32 = arith.constant 0 : i32
    %c0_i32_0 = arith.constant 0 : i32
    return %arg0, %c0_i32 : i32, i32
  }
  func.func @transform_10(%arg0: i32) -> (i32, i32) {
    %c0_i32 = arith.constant 0 : i32
    %c0_i32_0 = arith.constant 0 : i32
    %c0_i32_1 = arith.constant 0 : i32
    return %c0_i32, %c0_i32_0 : i32, i32
  }
  func.func @transform_11(%arg0: i32) -> (i32, i32) {
    %c0_i32 = arith.constant 0 : i32
    %c0_i32_0 = arith.constant 0 : i32
    %c0_i32_1 = arith.constant 0 : i32
    return %c0_i32, %c0_i32_0 : i32, i32
  }
  func.func @transform_12(%arg0: i32) -> (i32, i32) {
    %c0_i32 = arith.constant 0 : i32
    %c0_i32_0 = arith.constant 0 : i32
    return %arg0, %c0_i32 : i32, i32
  }
}

</mosaic_0001>

<bundles_post_ra>
// kernel: tpu_custom_call.1
= control target key start
LH: loop header
LB: loop body
LE: loop exit
PB: predicated region body
PF: predicated region fallthrough
CT: control target
= control target key end

     0   :  { %17 = vsyncpa [#allocation3], 0  ;;  %s842_s0 = inlined_call_operand.vmem [shape: f32[16,12], index: 0, kind: input, shape index: {}]   ;;  %s843_s1 = inlined_call_operand.vmem [shape: bf16[12,64], index: 1, kind: input, shape index: {}]   ;;  %s844_s2 = inlined_call_operand.hbm [shape: f32[3,64], index: 2, kind: input, shape index: {}]   ;;  %s845_s3 = inlined_call_operand.vmem [shape: bf16[16,64], index: 3, kind: input, shape index: {}]   ;;  %s846_s4 = inlined_call_operand.vmem [shape: bf16[64,32], index: 4, kind: input, shape index: {}]   ;;  %s847_s5 = inlined_call_operand.vmem [shape: f32[3,32], index: 5, kind: input, shape index: {}]   ;;  %s848_s6 = inlined_call_operand.vmem [shape: bf16[16,32], index: 6, kind: input, shape index: {}]   ;;  %s849_s7 = inlined_call_operand.vmem [shape: bf16[32,16], index: 7, kind: input, shape index: {}]   ;;  %s850_s8 = inlined_call_operand.hbm [shape: f32[3,16], index: 8, kind: input, shape index: {}]   ;;  %s851_s9 = inlined_call_operand.vmem [shape: bf16[16,16], index: 9, kind: input, shape index: {}]   ;;  %s852_s10 = inlined_call_operand.vmem [shape: bf16[16,128], index: 10, kind: input, shape index: {}]   ;;  %s853_s11 = inlined_call_operand.vmem [shape: f32[1,128], index: 11, kind: input, shape index: {}]   ;;  %s854_s12 = inlined_call_operand.hbm [shape: bf16[16,128], index: 12, kind: output, shape index: {}]  }
   0x1   :  { %18 = vsyncpa [#allocation6], 0 }
   0x2   :  { %19 = vsyncpa [#allocation4], 0  ;;  %s29_s23 = sshll.u32 %s844_s2, 4  ;;  %s646_s24 = smov [#allocation2]   ;;  %s30_s23 = int_to_ptr.hbm [resolvable:$true] %s29_s23 }
   0x3   :  { %s31_s25 = sshll.u32 %s646_s24, 4  ;;  %s50_s28 = sshll.u32 %s850_s8, 4  ;;  %s32_s25 = int_to_ptr.vmem [resolvable:$true] %s31_s25  ;;  %s51_s28 = int_to_ptr.hbm [resolvable:$true] %s50_s28 }
   0x4   :  { %34 = dma.hbm_to_vmem [thread:$0]  %s30_s23, 64, %s32_s25, [#allocation3]  }
   0x5   :  { %s647_s29 = smov [#allocation5]  }
   0x6   :  { %s52_s30 = sshll.u32 %s647_s29, 4  ;;  %s53_s30 = int_to_ptr.vmem [resolvable:$true] %s52_s30 }
   0x7   :  { %55 = dma.hbm_to_vmem [thread:$0]  %s51_s28, 64, %s53_s30, [#allocation6]  }
   0x8   :  { %640 = dma.done.wait [#allocation3], 64  }
   0x9   :  { %641 = vsyncadd [#allocation3], 4294967232 }
   0xa   :  { %642 = dma.done.wait [#allocation6], 64  }
   0xb   :  { %643 = vsyncadd [#allocation6], 4294967232  ;;  %v478_v0 = vld [vmem:[%s843_s1] sm:$0xf]  ;;  %v512_v1 = vld [vmem:[%s843_s1] sm:$0x30] }
   0xc   :  { %vm89_vm0 = vcmask 1045504   ;;  %v71_v2 = vld [vmem:[%s842_s0] sm:$0xff]  ;;  %v479_v3 = vor.u32 %v512_v1, %v478_v0  ;;  %v72_v4 = vld [vmem:[%s842_s0 + $0x8] sm:$0xff]  ;;  %vm85_vm1 = vcmask 97280   ;;  %vm107_vm2 = vcmask 523264   ;;  %v516_v28 = vld [vmem:[%s846_s4 + $0x18] sm:$0xff] }
   0xd   :  { %v78_v6 = vpack.c.bf16 %v72_v4, %v71_v2  ;;  %v737_v7 = vld [vmem:[#allocation2] sm:$0x7]  ;;  %v648_v19 = vmov 64.0   ;;  %221 = vmatpush.bf16.msra.mxu1 %v516_v28  ;;  %v515_v33 = vld [vmem:[%s846_s4 + $0x10] sm:$0xff]  ;;  %v514_v35 = vld [vmem:[%s846_s4 + $0x8] sm:$0xff]  ;;  %vm231_vm10 = vcmask 261120  }
   0xe   :  { %v91_v5 = vsel %vm89_vm0, %v479_v3, 0  ;;  %v79_v8 = vperm.slane %v737_v7, 0  ;;  %546 = vrcp.f32 %v648_v19  ;;  %v513_v41 = vld [vmem:[%s846_s4] sm:$0xff]  ;;  %v163_v52 = vperm.slane %v737_v7, 1  ;;  %s652_s18 = smov 64   ;;  %s653_s0 = smov 4  }
   0xf   :  { %100 = vmatpush.bf16.msra.mxu0 %v91_v5  ;;  %v168_v61 = vperm.slane %v737_v7, 2  ;;  %v521_v4 = vld [vmem:[%s845_s3] sm:$0xff]  }
  0x11   :  { %222 = vmatpush.bf16.msra.mxu1 %v515_v33 }
  0x12   :  { %480 = vmatmul.msk.bf16.vlgmr.msra.gmra.mxu0 %vm85_vm1, %v78_v6  ;;  %v522_v6 = vunpack.c.l.bf16 %v521_v4 }
  0x14   :  { %v547_v20 = vpop.eup %546 }
  0x15   :  { %v115_v21 = vmul.f32 64.0, %v547_v20  ;;  %vm119_vm3 = vweird.f32 %v547_v20  ;;  %223 = vmatpush.bf16.msra.mxu1 %v514_v35 }
  0x17   :  { %v116_v22 = vsub.f32 1.0, %v115_v21 }
  0x19   :  { %v117_v23 = vmul.f32 %v547_v20, %v116_v22  ;;  %224 = vmatpush.bf16.msra.mxu1 %v513_v41 }
  0x1b   :  { %v118_v24 = vadd.f32 %v547_v20, %v117_v23 }
  0x1d   :  { %v120_v25 = vsel %vm119_vm3, %v547_v20, %v118_v24 }
  0x8f   :  { %v102_v9 = vpop.f32.mrf.mxu0 }
  0x90   :  { %v740_v10 = vadd.f32 %v102_v9, %v79_v8 }
  0x92   :  { %v108_v11 = vsel %vm107_vm2, %v740_v10, 0.0  ;;  %v123_v12 = vmul.f32 %v740_v10, %v740_v10 }
  0x93   :  { %109 = vadd.xlane.f32.xlu0 %v108_v11 }
  0x94   :  { %v125_v13 = vsel %vm107_vm2, %v123_v12, 0.0 }
  0x95   :  { %126 = vadd.xlane.f32.xlu1 %v125_v13 }
  0x97   :  { %v104_v14 = vpop.f32.mrf.mxu0 }
  0x98   :  { %v747_v15 = vadd.f32 %v104_v14, %v79_v8  ;;  %v523_v8 = vunpack.c.h.bf16 %v521_v4  ;;  %v777_v14 = vld [vmem:[%s847_s5] sm:$0x7] }
  0x9a   :  { %v111_v16 = vsel %vm107_vm2, %v747_v15, 0.0  ;;  %v124_v17 = vmul.f32 %v747_v15, %v747_v15 }
  0x9b   :  { %112 = vadd.xlane.f32.xlu0 %v111_v16 }
  0x9c   :  { %v128_v18 = vsel %vm107_vm2, %v124_v17, 0.0 }
  0x9d   :  { %129 = vadd.xlane.f32.xlu1 %v128_v18 }
 0x106   :  { %v110_v26 = vpop.xlane.xlu0 %109 }
 0x107   :  { %v121_v27 = vmul.f32 %v120_v25, %v110_v26  ;;  %v649_v26 = vmov 32.0  }
 0x108   :  { %v127_v29 = vpop.xlane.xlu1 %126 }
 0x109   :  { %v133_v30 = vmul.f32 %v121_v27, %v121_v27  ;;  %v131_v31 = vmul.f32 %v127_v29, %v120_v25  ;;  %v139_v59 = vsub.f32 %v740_v10, %v121_v27 }
 0x10b   :  { %v135_v32 = vsub.f32 %v131_v31, %v133_v30 }
 0x10d   :  { %v137_v34 = vmax.f32 %v135_v32, 0.0 }
 0x10e   :  { %v113_v36 = vpop.xlane.xlu0 %112 }
 0x10f   :  { %v141_v37 = vadd.f32 1e-05, %v137_v34  ;;  %v122_v38 = vmul.f32 %v120_v25, %v113_v36 }
 0x110   :  { %v130_v39 = vpop.xlane.xlu1 %129 }
 0x111   :  { %548 = vrsqrt.f32 %v141_v37  ;;  %v134_v40 = vmul.f32 %v122_v38, %v122_v38  ;;  %v132_v42 = vmul.f32 %v130_v39, %v120_v25  ;;  %vm149_vm5 = vweird.f32 %v141_v37  ;;  %v518_v39 = vld [vmem:[%s849_s7 + $0x8] sm:$0xff] }
 0x112   :  { %v140_v1 = vsub.f32 %v747_v15, %v122_v38  ;;  %v189_v15 = vperm.slane %v777_v14, 0  ;;  %331 = vmatpush.bf16.msra.mxu2 %v518_v39 }
 0x113   :  { %v136_v43 = vsub.f32 %v132_v42, %v134_v40  ;;  %v517_v42 = vld [vmem:[%s849_s7] sm:$0xff] }
 0x115   :  { %v138_v44 = vmax.f32 %v136_v43, 0.0 }
 0x116   :  { %332 = vmatpush.bf16.msra.mxu2 %v517_v42 }
 0x117   :  { %v549_v45 = vpop.eup %548  ;;  %v142_v47 = vadd.f32 1e-05, %v138_v44 }
 0x118   :  { %v144_v46 = vmul.f32 %v549_v45, %v141_v37  ;;  %vm150_vm4 = vweird.f32 %v549_v45 }
 0x119   :  { %550 = vrsqrt.f32 %v142_v47  ;;  %vm151_vm6 = vmor %vm149_vm5, %vm150_vm4  ;;  %vm159_vm8 = vweird.f32 %v142_v47 }
 0x11a   :  { %v145_v48 = vmul.f32 %v549_v45, %v144_v46  ;;  %552 = vrcp.f32 %v649_v26 }
 0x11c   :  { %v146_v49 = vmul.f32 0.5, %v145_v48 }
 0x11e   :  { %v147_v50 = vsub.f32 1.5, %v146_v49 }
 0x11f   :  { %v551_v51 = vpop.eup %550 }
 0x120   :  { %v148_v53 = vmul.f32 %v549_v45, %v147_v50  ;;  %v154_v54 = vmul.f32 %v551_v51, %v142_v47  ;;  %vm160_vm7 = vweird.f32 %v551_v51  ;;  %v553_v27 = vpop.eup %552 }
 0x121   :  { %vm161_vm9 = vmor %vm159_vm8, %vm160_vm7  ;;  %v239_v28 = vmul.f32 32.0, %v553_v27  ;;  %vm243_vm11 = vweird.f32 %v553_v27 }
 0x122   :  { %v152_v55 = vsel %vm151_vm6, %v549_v45, %v148_v53  ;;  %v155_v56 = vmul.f32 %v551_v51, %v154_v54 }
 0x123   :  { %v164_v57 = vmul.f32 %v163_v52, %v152_v55  ;;  %v240_v29 = vsub.f32 1.0, %v239_v28 }
 0x124   :  { %v156_v58 = vmul.f32 0.5, %v155_v56 }
 0x125   :  { %v166_v62 = vmul.f32 %v164_v57, %v139_v59  ;;  %v241_v30 = vmul.f32 %v553_v27, %v240_v29  ;;  %v287_v57 = vperm.slane %v777_v14, 1 }
 0x126   :  { %v157_v60 = vsub.f32 1.5, %v156_v58 }
 0x127   :  { %v169_v3 = vadd.f32 %v168_v61, %v166_v62  ;;  %v242_v31 = vadd.f32 %v553_v27, %v241_v30 }
 0x128   :  { %v158_v63 = vmul.f32 %v551_v51, %v157_v60 }
 0x129   :  { %v171_v10 = vmax.f32 %v169_v3, 0.0  ;;  %v244_v32 = vsel %vm243_vm11, %v553_v27, %v242_v31  ;;  %v650_v31 = vmov 16.0  }
 0x12a   :  { %v162_v0 = vsel %vm161_vm9, %v551_v51, %v158_v63 }
 0x12b   :  { %v165_v2 = vmul.f32 %v163_v52, %v162_v0  ;;  %v175_v7 = vmul.f32 %v522_v6, %v171_v10  ;;  %v525_v10 = vld [vmem:[%s848_s6] sm:$0xff]  }
 0x12d   :  { %v167_v5 = vmul.f32 %v165_v2, %v140_v1  ;;  %v292_v2 = vperm.slane %v777_v14, 2 }
 0x12f   :  { %v170_v9 = vadd.f32 %v168_v61, %v167_v5 }
 0x131   :  { %v172_v11 = vmax.f32 %v170_v9, 0.0 }
 0x133   :  { %v176_v12 = vmul.f32 %v523_v8, %v172_v11 }
 0x135   :  { %v188_v13 = vpack.c.bf16 %v176_v12, %v175_v7  ;;  %v526_v7 = vunpack.c.l.bf16 %v525_v10  ;;  %v527_v12 = vunpack.c.h.bf16 %v525_v10 }
 0x137   :  { %497 = vmatmul.msk.bf16.vlgmr.msra.gmra.mxu1 %vm107_vm2, %v188_v13  ;;  %vm339_vm2 = vcmask 130048  }
 0x1b4   :  { %v226_v16 = vpop.f32.mrf.mxu1 }
 0x1b5   :  { %v780_v17 = vadd.f32 %v226_v16, %v189_v15 }
 0x1b7   :  { %v232_v18 = vsel %vm231_vm10, %v780_v17, 0.0  ;;  %v247_v19 = vmul.f32 %v780_v17, %v780_v17 }
 0x1b8   :  { %233 = vadd.xlane.f32.xlu2 %v232_v18 }
 0x1b9   :  { %v249_v20 = vsel %vm231_vm10, %v247_v19, 0.0  ;;  %v808_v19 = vld [vmem:[#allocation5] sm:$0x7] }
 0x1ba   :  { %250 = vadd.xlane.f32.xlu0 %v249_v20  ;;  %v309_v20 = vperm.slane %v808_v19, 0 }
 0x1bc   :  { %v228_v21 = vpop.f32.mrf.mxu1 }
 0x1bd   :  { %v787_v22 = vadd.f32 %v228_v21, %v189_v15 }
 0x1bf   :  { %v235_v23 = vsel %vm231_vm10, %v787_v22, 0.0  ;;  %v248_v24 = vmul.f32 %v787_v22, %v787_v22 }
 0x1c0   :  { %236 = vadd.xlane.f32.xlu2 %v235_v23 }
 0x1c1   :  { %v252_v25 = vsel %vm231_vm10, %v248_v24, 0.0 }
 0x1c2   :  { %253 = vadd.xlane.f32.xlu1 %v252_v25 }
 0x22b   :  { %v234_v33 = vpop.xlane.xlu2 %233 }
 0x22c   :  { %v245_v34 = vmul.f32 %v244_v32, %v234_v33 }
 0x22d   :  { %v251_v35 = vpop.xlane.xlu0 %250 }
 0x22e   :  { %v257_v36 = vmul.f32 %v245_v34, %v245_v34  ;;  %v255_v37 = vmul.f32 %v251_v35, %v244_v32  ;;  %v263_v0 = vsub.f32 %v780_v17, %v245_v34 }
 0x230   :  { %v259_v38 = vsub.f32 %v255_v37, %v257_v36 }
 0x232   :  { %v261_v40 = vmax.f32 %v259_v38, 0.0 }
 0x233   :  { %v237_v41 = vpop.xlane.xlu2 %236 }
 0x234   :  { %v265_v43 = vadd.f32 1e-05, %v261_v40  ;;  %v246_v44 = vmul.f32 %v244_v32, %v237_v41 }
 0x235   :  { %v254_v45 = vpop.xlane.xlu1 %253 }
 0x236   :  { %554 = vrsqrt.f32 %v265_v43  ;;  %v258_v46 = vmul.f32 %v246_v44, %v246_v44  ;;  %v256_v47 = vmul.f32 %v254_v45, %v244_v32  ;;  %vm273_vm13 = vweird.f32 %v265_v43 }
 0x237   :  { %v264_v6 = vsub.f32 %v787_v22, %v246_v44  ;;  %v519_v44 = vld [vmem:[%s852_s10] sm:$0xff] }
 0x238   :  { %v260_v48 = vsub.f32 %v256_v47, %v258_v46  ;;  %432 = vmatpush.bf16.msra.mxu3 %v519_v44 }
 0x23a   :  { %v262_v49 = vmax.f32 %v260_v48, 0.0 }
 0x23c   :  { %v555_v50 = vpop.eup %554  ;;  %v266_v52 = vadd.f32 1e-05, %v262_v49 }
 0x23d   :  { %v268_v51 = vmul.f32 %v555_v50, %v265_v43  ;;  %vm274_vm12 = vweird.f32 %v555_v50 }
 0x23e   :  { %556 = vrsqrt.f32 %v266_v52  ;;  %vm275_vm14 = vmor %vm273_vm13, %vm274_vm12  ;;  %vm283_vm0 = vweird.f32 %v266_v52 }
 0x23f   :  { %v269_v53 = vmul.f32 %v555_v50, %v268_v51  ;;  %558 = vrcp.f32 %v650_v31 }
 0x241   :  { %v270_v54 = vmul.f32 0.5, %v269_v53 }
 0x243   :  { %v271_v55 = vsub.f32 1.5, %v270_v54 }
 0x244   :  { %v557_v56 = vpop.eup %556 }
 0x245   :  { %v272_v58 = vmul.f32 %v555_v50, %v271_v55  ;;  %v278_v59 = vmul.f32 %v557_v56, %v266_v52  ;;  %vm284_vm15 = vweird.f32 %v557_v56  ;;  %v559_v32 = vpop.eup %558 }
 0x246   :  { %vm285_vm1 = vmor %vm283_vm0, %vm284_vm15  ;;  %v347_v33 = vmul.f32 16.0, %v559_v32  ;;  %vm351_vm3 = vweird.f32 %v559_v32 }
 0x247   :  { %v276_v60 = vsel %vm275_vm14, %v555_v50, %v272_v58  ;;  %v279_v61 = vmul.f32 %v557_v56, %v278_v59 }
 0x248   :  { %v288_v62 = vmul.f32 %v287_v57, %v276_v60  ;;  %v348_v34 = vsub.f32 1.0, %v347_v33 }
 0x249   :  { %v280_v63 = vmul.f32 0.5, %v279_v61  ;;  %v395_v61 = vperm.slane %v808_v19, 1 }
 0x24a   :  { %v290_v3 = vmul.f32 %v288_v62, %v263_v0  ;;  %v349_v35 = vmul.f32 %v559_v32, %v348_v34 }
 0x24b   :  { %v281_v1 = vsub.f32 1.5, %v280_v63 }
 0x24c   :  { %v293_v9 = vadd.f32 %v292_v2, %v290_v3  ;;  %v350_v36 = vadd.f32 %v559_v32, %v349_v35 }
 0x24d   :  { %v282_v4 = vmul.f32 %v557_v56, %v281_v1 }
 0x24e   :  { %v295_v15 = vmax.f32 %v293_v9, 0.0  ;;  %v352_v37 = vsel %vm351_vm3, %v559_v32, %v350_v36 }
 0x24f   :  { %v286_v5 = vsel %vm285_vm1, %v557_v56, %v282_v4 }
 0x250   :  { %v289_v8 = vmul.f32 %v287_v57, %v286_v5  ;;  %v299_v14 = vmul.f32 %v526_v7, %v295_v15 }
 0x252   :  { %v291_v11 = vmul.f32 %v289_v8, %v264_v6  ;;  %v400_v6 = vperm.slane %v808_v19, 2 }
 0x254   :  { %v294_v13 = vadd.f32 %v292_v2, %v291_v11 }
 0x256   :  { %v296_v16 = vmax.f32 %v294_v13, 0.0  ;;  %v529_v13 = vld [vmem:[%s851_s9] sm:$0xff]   ;;  %s651_s9 = smov [#allocation7]  }
 0x257   :  { %s460_s8 = sshll.u32 %s651_s9, 4  ;;  %s461_s8 = int_to_ptr.vmem [resolvable:$true] %s460_s8 }
 0x258   :  { %v300_v17 = vmul.f32 %v527_v12, %v296_v16  ;;  %v530_v16 = vunpack.c.l.bf16 %v529_v13 }
 0x25a   :  { %v308_v18 = vpack.c.bf16 %v300_v17, %v299_v14  ;;  %v531_v14 = vunpack.c.h.bf16 %v529_v13 }
 0x25c   :  { %506 = vmatmul.msk.bf16.vlgmr.msra.gmra.mxu2 %vm231_vm10, %v308_v18 }
 0x2df   :  { %v334_v21 = vpop.f32.mrf.mxu2 }
 0x2e0   :  { %v811_v22 = vadd.f32 %v334_v21, %v309_v20 }
 0x2e2   :  { %v340_v23 = vsel %vm339_vm2, %v811_v22, 0.0  ;;  %v355_v24 = vmul.f32 %v811_v22, %v811_v22 }
 0x2e3   :  { %341 = vadd.xlane.f32.xlu2 %v340_v23  ;;  %v545_v23 = vld [vmem:[%s853_s11] ss:$0 sm:$0xff]  ;;  %s462_s11 = sshll.u32 %s854_s12, 4  ;;  %s463_s11 = int_to_ptr.hbm [resolvable:$true] %s462_s11 }
 0x2e4   :  { %v357_v25 = vsel %vm339_vm2, %v355_v24, 0.0 }
 0x2e5   :  { %358 = vadd.xlane.f32.xlu1 %v357_v25 }
 0x2e7   :  { %v336_v26 = vpop.f32.mrf.mxu2 }
 0x2e8   :  { %v818_v27 = vadd.f32 %v336_v26, %v309_v20 }
 0x2ea   :  { %v343_v28 = vsel %vm339_vm2, %v818_v27, 0.0  ;;  %v356_v29 = vmul.f32 %v818_v27, %v818_v27 }
 0x2eb   :  { %344 = vadd.xlane.f32.xlu0 %v343_v28 }
 0x2ec   :  { %v360_v30 = vsel %vm339_vm2, %v356_v29, 0.0 }
 0x2ed   :  { %361 = vadd.xlane.f32.xlu2 %v360_v30 }
 0x356   :  { %v342_v38 = vpop.xlane.xlu2 %341 }
 0x357   :  { %v353_v39 = vmul.f32 %v352_v37, %v342_v38 }
 0x358   :  { %v359_v40 = vpop.xlane.xlu1 %358 }
 0x359   :  { %v365_v41 = vmul.f32 %v353_v39, %v353_v39  ;;  %v363_v42 = vmul.f32 %v359_v40, %v352_v37  ;;  %v371_v4 = vsub.f32 %v811_v22, %v353_v39 }
 0x35b   :  { %v367_v43 = vsub.f32 %v363_v42, %v365_v41 }
 0x35d   :  { %v369_v45 = vmax.f32 %v367_v43, 0.0 }
 0x35e   :  { %v345_v46 = vpop.xlane.xlu0 %344 }
 0x35f   :  { %v373_v47 = vadd.f32 1e-05, %v369_v45  ;;  %v354_v48 = vmul.f32 %v352_v37, %v345_v46 }
 0x360   :  { %v362_v49 = vpop.xlane.xlu2 %361 }
 0x361   :  { %560 = vrsqrt.f32 %v373_v47  ;;  %v366_v50 = vmul.f32 %v354_v48, %v354_v48  ;;  %v364_v51 = vmul.f32 %v362_v49, %v352_v37  ;;  %vm381_vm5 = vweird.f32 %v373_v47 }
 0x362   :  { %v372_v11 = vsub.f32 %v818_v27, %v354_v48  ;;  %v439_v27 = vlaneseq }
 0x363   :  { %v368_v52 = vsub.f32 %v364_v51, %v366_v50 }
 0x364   :  { %v440_v30 = vand.u32 127, %v439_v27 }
 0x365   :  { %v370_v53 = vmax.f32 %v368_v52, 0.0 }
 0x366   :  { %vm449_vm10 = vcmp.lt.s32.totalorder %v440_v30, 4 }
 0x367   :  { %v561_v54 = vpop.eup %560  ;;  %v374_v56 = vadd.f32 1e-05, %v370_v53 }
 0x368   :  { %v376_v55 = vmul.f32 %v561_v54, %v373_v47  ;;  %vm382_vm4 = vweird.f32 %v561_v54 }
 0x369   :  { %562 = vrsqrt.f32 %v374_v56  ;;  %vm383_vm6 = vmor %vm381_vm5, %vm382_vm4  ;;  %vm391_vm8 = vweird.f32 %v374_v56 }
 0x36a   :  { %v377_v57 = vmul.f32 %v561_v54, %v376_v55 }
 0x36c   :  { %v378_v58 = vmul.f32 0.5, %v377_v57 }
 0x36e   :  { %v379_v59 = vsub.f32 1.5, %v378_v58 }
 0x36f   :  { %v563_v60 = vpop.eup %562 }
 0x370   :  { %v380_v62 = vmul.f32 %v561_v54, %v379_v59  ;;  %v386_v63 = vmul.f32 %v563_v60, %v374_v56  ;;  %vm392_vm7 = vweird.f32 %v563_v60 }
 0x371   :  { %vm393_vm9 = vmor %vm391_vm8, %vm392_vm7 }
 0x372   :  { %v384_v0 = vsel %vm383_vm6, %v561_v54, %v380_v62  ;;  %v387_v1 = vmul.f32 %v563_v60, %v386_v63 }
 0x373   :  { %v396_v2 = vmul.f32 %v395_v61, %v384_v0 }
 0x374   :  { %v388_v3 = vmul.f32 0.5, %v387_v1 }
 0x375   :  { %v398_v8 = vmul.f32 %v396_v2, %v371_v4 }
 0x376   :  { %v389_v5 = vsub.f32 1.5, %v388_v3 }
 0x377   :  { %v401_v12 = vadd.f32 %v400_v6, %v398_v8 }
 0x378   :  { %v390_v9 = vmul.f32 %v563_v60, %v389_v5 }
 0x379   :  { %v403_v18 = vmax.f32 %v401_v12, 0.0 }
 0x37a   :  { %v394_v10 = vsel %vm393_vm9, %v563_v60, %v390_v9 }
 0x37b   :  { %v397_v7 = vmul.f32 %v395_v61, %v394_v10  ;;  %v407_v19 = vmul.f32 %v530_v16, %v403_v18 }
 0x37d   :  { %v399_v15 = vmul.f32 %v397_v7, %v372_v11 }
 0x37f   :  { %v402_v17 = vadd.f32 %v400_v6, %v399_v15 }
 0x381   :  { %v404_v20 = vmax.f32 %v402_v17, 0.0 }
 0x383   :  { %v408_v21 = vmul.f32 %v531_v14, %v404_v20 }
 0x385   :  { %v412_v22 = vpack.c.bf16 %v408_v21, %v407_v19 }
 0x387   :  { %511 = vmatmul.msk.bf16.vlgmr.msra.gmra.mxu3 %vm339_vm2, %v412_v22 }
 0x40a   :  { %v434_v24 = vpop.f32.mrf.mxu3 }
 0x40b   :  { %v435_v25 = vadd.f32 %v545_v23, %v434_v24 }
 0x40d   :  { %564 = vtanh.f32 %v435_v25  ;;  %v445_v31 = vmax.f32 %v435_v25, -20.0 }
 0x40f   :  { %v447_v35 = vmin.f32 %v445_v31, 2.0 }
 0x412   :  { %v436_v26 = vpop.f32.mrf.mxu3 }
 0x413   :  { %v437_v28 = vadd.f32 %v545_v23, %v436_v26  ;;  %v565_v29 = vpop.eup %564 }
 0x414   :  { %v443_v33 = vmul.f32 2.0, %v565_v29 }
 0x415   :  { %566 = vtanh.f32 %v437_v28  ;;  %v446_v32 = vmax.f32 %v437_v28, -20.0 }
 0x416   :  { %v450_v38 = vsel %vm449_vm10, %v443_v33, %v447_v35 }
 0x417   :  { %v448_v37 = vmin.f32 %v446_v32, 2.0 }
 0x41b   :  { %v567_v34 = vpop.eup %566 }
 0x41c   :  { %v444_v36 = vmul.f32 2.0, %v567_v34 }
 0x41e   :  { %v451_v39 = vsel %vm449_vm10, %v444_v36, %v448_v37 }
 0x41f   :  { %v535_v40 = vpack.c.bf16 %v451_v39, %v450_v38 }
 0x421   :  { %536 = vst [vmem:[#allocation7] sm:$0xff] %v535_v40  }
 0x422   :  { %468 = dma.vmem_to_hbm [thread:$0]  %s461_s8, 128, %s463_s11, [#allocation4], %s652_s18, %s652_s18, %s653_s0  }
 0x423   :  { %644 = dma.done.wait [#allocation4], 128  }
 0x424   :  { %645 = vsyncadd [#allocation4], 4294967168 }
 0x425   :  { %473 = vsyncpa [#allocation3], 1 }
 0x426   :  { %474 = vsyncpa [#allocation6], 1 }
 0x427   :  { %475 = vsyncpa [#allocation4], 1 }

</bundles_post_ra>
